<compile_context>
chip_gen: v7x
topology: tpu7x:2x2x1
jax: 0.10.0
libtpu: 0.0.40
codegen_flags: <defaults>
</compile_context>

<pallas_src>
import math
import jax
import jax.numpy as jnp
from jax.experimental import pallas as pl
from jax.experimental.pallas import tpu as pltpu

# ---------------- Config (mirrors EncoderConvNetL1.__init__) -----------------
NUM_FEATURE  = 16   # num_feature
NUM_MODALITY = 4    # num_modality  (Conv1d input channels)
NUM_SAMPLE   = 3    # num_sample    (>1 -> batch_id concatenated into fcEnc)
DIM_LATENT   = 8    # dim_latent
NUM_HIDDEN   = 32   # num_hidden_units
NUM_CHANNEL  = 6    # num_channel[0] (Conv1d output channels)
KERNEL       = 3    # size_conv_kernel
STRIDE       = 1    # size_stride (this kernel implements stride == 1)
BATCH        = 2

# convEnc_1_padding = ceil(F/stride - 1)*stride - F + K  (left "same"-style pad)
PAD = int(math.ceil(NUM_FEATURE / STRIDE) - 1) * STRIDE - NUM_FEATURE + KERNEL
CONV_OUT_LEN = (NUM_FEATURE + PAD - KERNEL) // STRIDE + 1   # == NUM_FEATURE for stride 1
PAD_W  = NUM_FEATURE + PAD                  # per-modality padded width (18)
FC_IN  = NUM_CHANNEL * CONV_OUT_LEN         # 96
FC_CAT = FC_IN + NUM_SAMPLE                 # 99
BN_EPS = 1e-5
OUT_W  = 3 * DIM_LATENT + NUM_MODALITY      # packed output: mean | var | z | lib_sums


# --------------------------- Fused forward kernel ----------------------------
def encoder_fused_kernel(x_ref, sid_ref, eps_ref,
                         wc_ref, wq_ref, ws_ref, wh_ref, wl_ref, b_ref,
                         out_ref):
    # x_ref: (B, M*(F+PAD)) raw counts, each modality left-padded with PAD zeros.
    x = x_ref[...]

    # library size factor: per-(batch, modality) sum of raw counts via a
    # modality-selector matmul (pad columns are zero -> do not change the sum).
    lib = jnp.dot(x, wl_ref[...], preferred_element_type=jnp.float32)   # (B, M)

    # torch: data = log(data + 1); then F.pad(..., (PAD, 0)) with zeros.
    # log(0 + 1) == 0, so log on the pre-padded raw counts is identical.
    xlog = jnp.log(x + 1.0)                                              # (B, M*PAD_W)

    # packed biases: [conv(bn1-folded, per-channel repeated) | fc(bn2-folded) | heads]
    b_conv = b_ref[:, 0:FC_IN]
    b_fc   = b_ref[:, FC_IN:FC_IN + NUM_HIDDEN]
    b_head = b_ref[:, FC_IN + NUM_HIDDEN:FC_IN + NUM_HIDDEN + 2 * DIM_LATENT]

    # Conv1d + BatchNorm1d(eval, folded) + ReLU as ONE direct banded matmul on
    # the padded log-input; result is already in torch's q.view(B, C1*L) layout.
    q = jnp.maximum(
        jnp.dot(xlog, wc_ref[...], preferred_element_type=jnp.float32) + b_conv,
        0.0)                                                             # (B, C1*L)

    # fcEnc(concat(q, batch_id)) + BatchNorm1d(eval, folded) + ReLU, with the
    # concat replaced by a split weight: q @ Wq + batch_id @ Ws.
    h = jnp.maximum(
        jnp.dot(q, wq_ref[...], preferred_element_type=jnp.float32)
        + jnp.dot(sid_ref[...], ws_ref[...], preferred_element_type=jnp.float32)
        + b_fc,
        0.0)                                                             # (B, H)

    # z_mean / z_logvar heads fused into one matmul, then reparameterized sample.
    heads = jnp.dot(h, wh_ref[...], preferred_element_type=jnp.float32) + b_head
    mean = heads[:, :DIM_LATENT]
    std = jnp.exp(0.5 * heads[:, DIM_LATENT:])                 # exp(0.5*logvar)
    var = std * std                                            # == exp(logvar)
    z = mean + std * eps_ref[...]                              # Normal(mean, sqrt(var)).rsample()

    # single lane-dense packed output
    out_ref[...] = jnp.concatenate([mean, var, z, lib], axis=-1)   # (B, 3L + M)
    # TODO(synk): Dropout is eval-mode identity (stochastic in train mode);
    #             BatchNorm uses running statistics (eval mode), folded into weights.


# ------------------------------- Wrapper --------------------------------------
def encoder_convnet_l1(data, batch_id, fused, eps):
    B, M, F = data.shape
    # glue: left-pad each modality with zeros, flatten modalities into lanes.
    x2 = jnp.pad(data, ((0, 0), (0, 0), (PAD, 0))).reshape(B, M * PAD_W)

    vspec = pl.BlockSpec(memory_space=pltpu.MemorySpace.VMEM)

    # NOTE(v7x): if B grows large, add a grid over batch tiles with
    # dimension_semantics=("parallel",) so both TensorCores share the work.
    packed = pl.pallas_call(
        encoder_fused_kernel,
        out_shape=jax.ShapeDtypeStruct((B, OUT_W), jnp.float32),
        in_specs=[vspec] * 9,
        out_specs=vspec,
    )(x2, batch_id, eps,
      fused["w_conv_direct"], fused["w_fc_q"], fused["w_fc_sid"],
      fused["w_heads"], fused["w_lib"], fused["bias_pack"])

    L = DIM_LATENT
    qz_mean = packed[:, 0:L]
    qz_var  = packed[:, L:2 * L]
    z       = packed[:, 2 * L:3 * L]
    lib     = jnp.broadcast_to(packed[:, 3 * L:3 * L + M, None], (B, M, F))
    return qz_mean, qz_var, z, lib


# ------------------- Parameter prep (host-side, done once) --------------------
def prepare_params(p):
    """Fold eval-mode BN into weights/biases and build fused kernel buffers."""
    # BN1 fold into conv
    s1 = p["bn1_gamma"] / jnp.sqrt(p["bn1_var"] + BN_EPS)                 # (C1,)
    w_conv_f = p["w_conv"] * s1[:, None, None]                            # (C1, M, K)
    b_conv_f = (p["b_conv"] - p["bn1_mean"]) * s1 + p["bn1_beta"]         # (C1,)

    # direct banded conv weight: row (m*PAD_W + p) -> col (c*L + l), value
    # w_conv_f[c, m, k] where p == l + k.
    p_idx = jnp.arange(PAD_W)[None, :, None]
    l_idx = jnp.arange(CONV_OUT_LEN)[None, None, :]
    k_idx = jnp.arange(KERNEL)[:, None, None]
    shift = (p_idx == l_idx + k_idx).astype(jnp.float32)                  # (K, PAD_W, L)
    w_conv_direct = jnp.einsum("cmk,kpl->mpcl", w_conv_f, shift).reshape(
        NUM_MODALITY * PAD_W, NUM_CHANNEL * CONV_OUT_LEN)                 # (72, 96)
    b_conv_big = jnp.repeat(b_conv_f, CONV_OUT_LEN)                       # (C1*L,)

    # library-size modality selector (ones over each modality's lane window)
    w_lib = jnp.repeat(jnp.eye(NUM_MODALITY, dtype=jnp.float32), PAD_W, axis=0)  # (72, M)

    # BN2 fold into fc (Linear weight is torch-layout (H, FC_IN + S)); split the
    # transposed weight into the q part and the batch_id part.
    s2 = p["bn2_gamma"] / jnp.sqrt(p["bn2_var"] + BN_EPS)                 # (H,)
    w_fc_full = jnp.transpose(p["w_fc"] * s2[:, None])                    # (FC_CAT, H)
    w_fc_q = w_fc_full[:FC_IN]                                            # (96, H)
    w_fc_sid = w_fc_full[FC_IN:]                                          # (S, H)
    b_fc = (p["b_fc"] - p["bn2_mean"]) * s2 + p["bn2_beta"]               # (H,)

    # fused latent heads: columns [mean | logvar]
    w_heads = jnp.concatenate(
        [jnp.transpose(p["w_mu"]), jnp.transpose(p["w_lv"])], axis=1)     # (H, 2L)
    b_heads = jnp.concatenate([p["b_mu"], p["b_lv"]])                     # (2L,)

    bias_pack = jnp.concatenate([b_conv_big, b_fc, b_heads])[None, :]     # (1, 144)
    return dict(w_conv_direct=w_conv_direct, w_fc_q=w_fc_q, w_fc_sid=w_fc_sid,
                w_heads=w_heads, w_lib=w_lib, bias_pack=bias_pack)


# --------------------------- Deterministic params ------------------------------
def init_params(key):
    ks = jax.random.split(key, 16)

    def u(k, shape, scale=0.2):
        return jax.random.uniform(k, shape, jnp.float32, -1.0, 1.0) * scale

    # torch layouts: Conv1d weight (C_out, C_in, K); Linear weight (out, in)
    return dict(
        w_conv=u(ks[0], (NUM_CHANNEL, NUM_MODALITY, KERNEL)),
        b_conv=u(ks[1], (NUM_CHANNEL,)),
        bn1_gamma=1.0 + u(ks[2], (NUM_CHANNEL,), 0.1),
        bn1_beta=u(ks[3], (NUM_CHANNEL,), 0.1),
        bn1_mean=u(ks[4], (NUM_CHANNEL,), 0.1),
        bn1_var=1.0 + jnp.abs(u(ks[5], (NUM_CHANNEL,), 0.1)),
        w_fc=u(ks[6], (NUM_HIDDEN, FC_CAT)),
        b_fc=u(ks[7], (NUM_HIDDEN,)),
        bn2_gamma=1.0 + u(ks[8], (NUM_HIDDEN,), 0.1),
        bn2_beta=u(ks[9], (NUM_HIDDEN,), 0.1),
        bn2_mean=u(ks[10], (NUM_HIDDEN,), 0.1),
        bn2_var=1.0 + jnp.abs(u(ks[11], (NUM_HIDDEN,), 0.1)),
        w_mu=u(ks[12], (DIM_LATENT, NUM_HIDDEN)),
        b_mu=u(ks[13], (DIM_LATENT,)),
        w_lv=u(ks[14], (DIM_LATENT, NUM_HIDDEN)),
        b_lv=u(ks[15], (DIM_LATENT,)),
    )


# ------------------------ Pure-JAX reference (unfused) -------------------------
def reference_forward(data, batch_id, p, eps):
    B, M, F = data.shape
    lib = jnp.broadcast_to(jnp.sum(data, axis=-1, keepdims=True), (B, M, F))
    x = jnp.log(data + 1.0)
    xpad = jnp.pad(x, ((0, 0), (0, 0), (PAD, 0)))
    conv = jnp.zeros((B, NUM_CHANNEL, CONV_OUT_LEN), jnp.float32)
    for k in range(KERNEL):
        conv = conv + jnp.einsum("cm,bml->bcl", p["w_conv"][:, :, k],
                                 xpad[:, :, k:k + CONV_OUT_LEN])
    conv = conv + p["b_conv"][None, :, None]
    conv = ((conv - p["bn1_mean"][None, :, None])
            / jnp.sqrt(p["bn1_var"][None, :, None] + BN_EPS)
            * p["bn1_gamma"][None, :, None] + p["bn1_beta"][None, :, None])
    q = jnp.maximum(conv, 0.0).reshape(B, -1)
    q_cat = jnp.concatenate([q, batch_id], axis=-1)
    h = q_cat @ p["w_fc"].T + p["b_fc"]
    h = (h - p["bn2_mean"]) / jnp.sqrt(p["bn2_var"] + BN_EPS) * p["bn2_gamma"] + p["bn2_beta"]
    h = jnp.maximum(h, 0.0)
    mean = h @ p["w_mu"].T + p["b_mu"]
    var = jnp.exp(h @ p["w_lv"].T + p["b_lv"])
    z = mean + jnp.sqrt(var) * eps
    return mean, var, z, lib


if __name__ == "__main__":
    key = jax.random.PRNGKey(0)
    kd, kb, ke, kp = jax.random.split(key, 4)

    # data: non-negative "counts" (B, M, F); batch_id: one-hot (B, num_sample)
    data = jax.random.uniform(kd, (BATCH, NUM_MODALITY, NUM_FEATURE), jnp.float32, 0.0, 5.0)
    sample_idx = jax.random.randint(kb, (BATCH,), 0, NUM_SAMPLE)
    batch_id = jax.nn.one_hot(sample_idx, NUM_SAMPLE, dtype=jnp.float32)
    eps = jax.random.normal(ke, (BATCH, DIM_LATENT), jnp.float32)

    raw = init_params(kp)
    fused = prepare_params(raw)

    qz_mean, qz_var, z, lib = jax.jit(encoder_convnet_l1)(data, batch_id, fused, eps)
    jax.block_until_ready((qz_mean, qz_var, z, lib))

    assert qz_mean.shape == (BATCH, DIM_LATENT)
    assert qz_var.shape == (BATCH, DIM_LATENT)
    assert z.shape == (BATCH, DIM_LATENT)
    assert lib.shape == (BATCH, NUM_MODALITY, NUM_FEATURE)

    # correctness vs. unfused, unfolded pure-JAX reference
    r_mean, r_var, r_z, r_lib = reference_forward(data, batch_id, raw, eps)
    for got, ref in ((qz_mean, r_mean), (qz_var, r_var), (z, r_z), (lib, r_lib)):
        assert jnp.allclose(got, ref, rtol=1e-3, atol=1e-4), \
            float(jnp.max(jnp.abs(got - ref)))

    print("KERNEL_OK")
</pallas_src>

<mosaic_0001>
module attributes {stable_mosaic.version = 11 : i64} {
  func.func @encoder_fused_kernel(%arg0: memref<2x72xf32, #tpu.memory_space<vmem>>, %arg1: memref<2x3xf32, #tpu.memory_space<vmem>>, %arg2: memref<2x8xf32, #tpu.memory_space<vmem>>, %arg3: memref<72x96xf32, #tpu.memory_space<vmem>>, %arg4: memref<96x32xf32, #tpu.memory_space<vmem>>, %arg5: memref<3x32xf32, #tpu.memory_space<vmem>>, %arg6: memref<32x16xf32, #tpu.memory_space<vmem>>, %arg7: memref<72x4xf32, #tpu.memory_space<vmem>>, %arg8: memref<1x144xf32, #tpu.memory_space<vmem>>, %arg9: memref<2x28xf32, #tpu.memory_space<vmem>>) attributes {dimension_semantics = [], scalar_prefetch = 0 : i64, scratch_operands = 0 : i64, tpu.core_type = #tpu.core_type<tc>} {
    %c0 = arith.constant 0 : index
    %c0_0 = arith.constant 0 : index
    %0 = vector.load %arg0[%c0, %c0_0] : memref<2x72xf32, #tpu.memory_space<vmem>>, vector<2x72xf32>
    %c0_1 = arith.constant 0 : index
    %c0_2 = arith.constant 0 : index
    %1 = vector.load %arg7[%c0_1, %c0_2] : memref<72x4xf32, #tpu.memory_space<vmem>>, vector<72x4xf32>
    %cst = arith.constant dense<0.000000e+00> : vector<2x4xf32>
    %2 = tpu.matmul %0, %1, %cst {dimension_numbers = #tpu.dot_dimension_numbers<[1], [0], [0], [1], [0, 0, 1, 1], [], []>} : vector<2x72xf32>, vector<72x4xf32>, vector<2x4xf32> -> vector<2x4xf32>
    %cst_3 = arith.constant 1.000000e+00 : f32
    %3 = vector.broadcast %cst_3 : f32 to vector<2x72xf32>
    %4 = arith.addf %0, %3 : vector<2x72xf32>
    %5 = math.log %4 : vector<2x72xf32>
    %c0_4 = arith.constant 0 : index
    %c0_5 = arith.constant 0 : index
    %6 = vector.load %arg8[%c0_4, %c0_5] : memref<1x144xf32, #tpu.memory_space<vmem>>, vector<1x96xf32>
    %c0_6 = arith.constant 0 : index
    %c96 = arith.constant 96 : index
    %7 = vector.load %arg8[%c0_6, %c96] : memref<1x144xf32, #tpu.memory_space<vmem>>, vector<1x32xf32>
    %c0_7 = arith.constant 0 : index
    %c128 = arith.constant 128 : index
    %8 = vector.load %arg8[%c0_7, %c128] : memref<1x144xf32, #tpu.memory_space<vmem>>, vector<1x16xf32>
    %c0_8 = arith.constant 0 : index
    %c0_9 = arith.constant 0 : index
    %9 = vector.load %arg3[%c0_8, %c0_9] : memref<72x96xf32, #tpu.memory_space<vmem>>, vector<72x96xf32>
    %cst_10 = arith.constant dense<0.000000e+00> : vector<2x96xf32>
    %10 = tpu.matmul %5, %9, %cst_10 {dimension_numbers = #tpu.dot_dimension_numbers<[1], [0], [0], [1], [0, 0, 1, 1], [], []>} : vector<2x72xf32>, vector<72x96xf32>, vector<2x96xf32> -> vector<2x96xf32>
    %11 = vector.broadcast %6 : vector<1x96xf32> to vector<2x96xf32>
    %12 = arith.addf %10, %11 : vector<2x96xf32>
    %cst_11 = arith.constant 0.000000e+00 : f32
    %13 = vector.broadcast %cst_11 : f32 to vector<2x96xf32>
    %14 = arith.maximumf %12, %13 : vector<2x96xf32>
    %c0_12 = arith.constant 0 : index
    %c0_13 = arith.constant 0 : index
    %15 = vector.load %arg4[%c0_12, %c0_13] : memref<96x32xf32, #tpu.memory_space<vmem>>, vector<96x32xf32>
    %cst_14 = arith.constant dense<0.000000e+00> : vector<2x32xf32>
    %16 = tpu.matmul %14, %15, %cst_14 {dimension_numbers = #tpu.dot_dimension_numbers<[1], [0], [0], [1], [0, 0, 1, 1], [], []>} : vector<2x96xf32>, vector<96x32xf32>, vector<2x32xf32> -> vector<2x32xf32>
    %c0_15 = arith.constant 0 : index
    %c0_16 = arith.constant 0 : index
    %17 = vector.load %arg1[%c0_15, %c0_16] : memref<2x3xf32, #tpu.memory_space<vmem>>, vector<2x3xf32>
    %c0_17 = arith.constant 0 : index
    %c0_18 = arith.constant 0 : index
    %18 = vector.load %arg5[%c0_17, %c0_18] : memref<3x32xf32, #tpu.memory_space<vmem>>, vector<3x32xf32>
    %cst_19 = arith.constant dense<0.000000e+00> : vector<2x32xf32>
    %19 = tpu.matmul %17, %18, %cst_19 {dimension_numbers = #tpu.dot_dimension_numbers<[1], [0], [0], [1], [0, 0, 1, 1], [], []>} : vector<2x3xf32>, vector<3x32xf32>, vector<2x32xf32> -> vector<2x32xf32>
    %20 = arith.addf %16, %19 : vector<2x32xf32>
    %21 = vector.broadcast %7 : vector<1x32xf32> to vector<2x32xf32>
    %22 = arith.addf %20, %21 : vector<2x32xf32>
    %cst_20 = arith.constant 0.000000e+00 : f32
    %23 = vector.broadcast %cst_20 : f32 to vector<2x32xf32>
    %24 = arith.maximumf %22, %23 : vector<2x32xf32>
    %c0_21 = arith.constant 0 : index
    %c0_22 = arith.constant 0 : index
    %25 = vector.load %arg6[%c0_21, %c0_22] : memref<32x16xf32, #tpu.memory_space<vmem>>, vector<32x16xf32>
    %cst_23 = arith.constant dense<0.000000e+00> : vector<2x16xf32>
    %26 = tpu.matmul %24, %25, %cst_23 {dimension_numbers = #tpu.dot_dimension_numbers<[1], [0], [0], [1], [0, 0, 1, 1], [], []>} : vector<2x32xf32>, vector<32x16xf32>, vector<2x16xf32> -> vector<2x16xf32>
    %27 = vector.broadcast %8 : vector<1x16xf32> to vector<2x16xf32>
    %28 = arith.addf %26, %27 : vector<2x16xf32>
    %29 = vector.extract_strided_slice %28 {offsets = [0, 0], sizes = [2, 8], strides = [1, 1]} : vector<2x16xf32> to vector<2x8xf32>
    %30 = vector.extract_strided_slice %28 {offsets = [0, 8], sizes = [2, 8], strides = [1, 1]} : vector<2x16xf32> to vector<2x8xf32>
    %cst_24 = arith.constant 5.000000e-01 : f32
    %31 = vector.broadcast %cst_24 : f32 to vector<2x8xf32>
    %32 = arith.mulf %31, %30 : vector<2x8xf32>
    %33 = math.exp %32 : vector<2x8xf32>
    %34 = arith.mulf %33, %33 : vector<2x8xf32>
    %c0_25 = arith.constant 0 : index
    %c0_26 = arith.constant 0 : index
    %35 = vector.load %arg2[%c0_25, %c0_26] : memref<2x8xf32, #tpu.memory_space<vmem>>, vector<2x8xf32>
    %36 = arith.mulf %33, %35 : vector<2x8xf32>
    %37 = arith.addf %29, %36 : vector<2x8xf32>
    %38 = tpu.concatenate %29, %34, %37, %2 in 1 : vector<2x8xf32>, vector<2x8xf32>, vector<2x8xf32>, vector<2x4xf32> -> vector<2x28xf32>
    %c0_27 = arith.constant 0 : index
    %c0_28 = arith.constant 0 : index
    %39 = vector.load %arg9[%c0_27, %c0_28] : memref<2x28xf32, #tpu.memory_space<vmem>>, vector<2x28xf32>
    tpu.vector_store %arg9[%c0_27, %c0_28], %38 {strides = array<i32>} : memref<2x28xf32, #tpu.memory_space<vmem>>, vector<2x28xf32>,
    return
  }
}

</mosaic_0001>

<bundles_post_ra>
// kernel: encoder_convnet_l1.1
= control target key start
LH: loop header
LB: loop body
LE: loop exit
PB: predicated region body
PF: predicated region fallthrough
CT: control target
= control target key end

     0   :  { %v693_v0 = vmov 0.0|0.0   ;;  %vm694_vm0 = vmmov 0   ;;  %v695_v4 = vmov 0.0   ;;  %vm42_vm1 = vcmask 588800   ;;  %s697_s30 = smov 8   ;;  %s700_s18 = smov 16   ;;  %s905_s3 = inlined_call_operand.vmem [shape: f32[72,96], index: 3, kind: input, shape index: {}]   ;;  %s906_s0 = inlined_call_operand.vmem [shape: f32[2,72], index: 0, kind: input, shape index: {}]   ;;  %s907_s7 = inlined_call_operand.vmem [shape: f32[72,4], index: 7, kind: input, shape index: {}]   ;;  %s908_s4 = inlined_call_operand.vmem [shape: f32[96,32], index: 4, kind: input, shape index: {}]   ;;  %s909_s5 = inlined_call_operand.vmem [shape: f32[3,32], index: 5, kind: input, shape index: {}]   ;;  %s910_s8 = inlined_call_operand.vmem [shape: f32[1,144], index: 8, kind: input, shape index: {}]   ;;  %s911_s1 = inlined_call_operand.vmem [shape: f32[2,3], index: 1, kind: input, shape index: {}]   ;;  %s912_s2 = inlined_call_operand.vmem [shape: f32[2,8], index: 2, kind: input, shape index: {}]   ;;  %s913_s6 = inlined_call_operand.vmem [shape: f32[32,16], index: 6, kind: input, shape index: {}]   ;;  %s914_s9 = inlined_call_operand.vmem [shape: f32[2,28], index: 9, kind: output, shape index: {}]  }
   0x1   :  { %645 = vmatprep.subr.bf16.mxu1 %v693_v0  ;;  %v121_v1 = vld [vmem:[%s905_s3] sm:$0xff]  ;;  %v122_v2 = vld [vmem:[%s905_s3 + $0x8] sm:$0xff]  ;;  %v123_v3 = vld [vmem:[%s905_s3 + $0x10] sm:$0xff]  ;;  %587 = vmatprep.mubr.msk.f32.mxu1 %vm694_vm0, %v695_v4  ;;  %vm228_vm2 = vcmask 1042432   ;;  %vm224_vm3 = vcmask 23552   ;;  %vm302_vm4 = vcmask 785408  }
   0x2   :  { %v646_v5 = vpack.c.bf16 %v122_v2, %v121_v1  ;;  %v124_v6 = vld [vmem:[%s905_s3 + $0x18] sm:$0xff]  ;;  %633 = vmatprep.subr.bf16.mxu0 %v693_v0  ;;  %566 = vmatprep.mubr.msk.f32.mxu0 %vm694_vm0, %v695_v4  ;;  %v125_v8 = vld [vmem:[%s905_s3 + $0x20] sm:$0xff]  ;;  %v126_v10 = vld [vmem:[%s905_s3 + $0x28] sm:$0xff]  ;;  %vm391_vm5 = vcmask 261120   ;;  %vm488_vm6 = vcmask 64512   ;;  %vm490_vm7 = vcmask 130048  }
   0x3   :  { %v649_v7 = vpack.c.bf16 %v124_v6, %v123_v3  ;;  %v32_v9 = vld [vmem:[%s906_s0] sm:$0x3]  ;;  %v34_v13 = vld [vmem:[%s907_s7 + $0x8] sm:$0xff]  ;;  %v35_v15 = vld [vmem:[%s907_s7 + $0x10] sm:$0xff]  ;;  %v652_v17 = vpack.c.bf16 %v126_v10, %v125_v8  ;;  %vm492_vm8 = vcmask 195584   ;;  %vm494_vm9 = vcmask 222208  }
   0x4   :  { %647 = vmatpush3.bf16.msra.mxu1 %v646_v5  ;;  %v116_v11 = vadd.f32 1.0, %v32_v9  ;;  %v33_v12 = vld [vmem:[%s907_s7] sm:$0xff]  ;;  %v36_v16 = vld [vmem:[%s907_s7 + $0x18] sm:$0xff]  ;;  %v127_v18 = vld [vmem:[%s905_s3 + $0x30] sm:$0xff] }
   0x5   :  { %648 = vmatprep.subr.bf16.mxu1 %v693_v0  ;;  %v634_v14 = vpack.c.bf16 %v34_v13, %v33_v12  ;;  %v637_v19 = vpack.c.bf16 %v36_v16, %v35_v15  ;;  %v128_v20 = vld [vmem:[%s905_s3 + $0x38] sm:$0xff]  ;;  %v37_v21 = vld [vmem:[%s907_s7 + $0x20] sm:$0xff]  ;;  %v38_v22 = vld [vmem:[%s907_s7 + $0x28] sm:$0xff] }
   0x6   :  { %689 = vlog2.f32 %v116_v11  ;;  %v655_v23 = vpack.c.bf16 %v128_v20, %v127_v18  ;;  %v640_v24 = vpack.c.bf16 %v38_v22, %v37_v21  ;;  %v39_v25 = vld [vmem:[%s907_s7 + $0x30] sm:$0xff]  ;;  %v40_v26 = vld [vmem:[%s907_s7 + $0x38] sm:$0xff]  ;;  %v210_v27 = vld [vmem:[%s908_s4] sm:$0xff] }
   0x7   :  { %635 = vmatpush3.bf16.msra.mxu0 %v634_v14  ;;  %v211_v28 = vld [vmem:[%s908_s4 + $0x8] sm:$0xff]  ;;  %v643_v29 = vpack.c.bf16 %v40_v26, %v39_v25  ;;  %v129_v31 = vld [vmem:[%s905_s3 + $0x40] sm:$0xff]  ;;  %v212_v34 = vld [vmem:[%s908_s4 + $0x10] sm:$0xff] }
   0x8   :  { %650 = vmatpush3.bf16.msra.mxu1 %v649_v7  ;;  %636 = vmatprep.subr.bf16.mxu0 %v693_v0  ;;  %v658_v33 = vpack.c.bf16 %v211_v28, %v210_v27  ;;  %v213_v35 = vld [vmem:[%s908_s4 + $0x18] sm:$0xff]  ;;  %v41_v36 = vld [vmem:[%s907_s7 + $0x40] sm:$0xff]  ;;  %v215_v39 = vld [vmem:[%s908_s4 + $0x28] sm:$0xff] }
   0x9   :  { %651 = vmatprep.subr.bf16.mxu1 %v693_v0  ;;  %v661_v37 = vpack.c.bf16 %v213_v35, %v212_v34  ;;  %v214_v38 = vld [vmem:[%s908_s4 + $0x20] sm:$0xff]  ;;  %v216_v41 = vld [vmem:[%s908_s4 + $0x30] sm:$0xff]  ;;  %v217_v42 = vld [vmem:[%s908_s4 + $0x38] sm:$0xff] }
   0xa   :  { %v664_v40 = vpack.c.bf16 %v215_v39, %v214_v38  ;;  %v667_v43 = vpack.c.bf16 %v217_v42, %v216_v41  ;;  %v218_v44 = vld [vmem:[%s908_s4 + $0x40] sm:$0xff]  ;;  %v219_v45 = vld [vmem:[%s908_s4 + $0x48] sm:$0xff]  ;;  %v220_v47 = vld [vmem:[%s908_s4 + $0x50] sm:$0xff] }
   0xb   :  { %638 = vmatpush3.bf16.msra.mxu0 %v637_v19  ;;  %v670_v46 = vpack.c.bf16 %v219_v45, %v218_v44  ;;  %v221_v48 = vld [vmem:[%s908_s4 + $0x58] sm:$0xff]  ;;  %v223_v50 = vld [vmem:[%s909_s5] sm:$0x7]  ;;  %s696_s4 = smov 32   ;;  %v382_v61 = vld [vmem:[%s913_s6 + $0x8] sm:$0xff] }
   0xc   :  { %653 = vmatpush3.bf16.msra.mxu1 %v652_v17  ;;  %639 = vmatprep.subr.bf16.mxu0 %v693_v0  ;;  %v673_v49 = vpack.c.bf16 %v221_v48, %v220_v47  ;;  %v222_v51 = vld [vmem:[%s911_s1] sm:$0x3]  ;;  %s698_s1 = smov 24   ;;  %v383_v2 = vld [vmem:[%s913_s6 + $0x10] sm:$0xff]  ;;  %v384_v3 = vld [vmem:[%s913_s6 + $0x18] sm:$0xff] }
   0xd   :  { %654 = vmatprep.subr.bf16.mxu1 %v693_v0  ;;  %v501_v52 = vld [vmem:[%s910_s8] ss:$0 sm:$0xff] }
   0xe   :  { %376 = vrot.lane.b32.xlu0 %v501_v52, %s696_s4  ;;  %v469_v53 = vld [vmem:[%s912_s2] sm:$0x3] }
   0xf   :  { %641 = vmatpush3.bf16.msra.mxu0 %v640_v24  ;;  %v381_v60 = vld [vmem:[%s913_s6] sm:$0xff]  ;;  %s699_s6 = smov 120  }
  0x10   :  { %656 = vmatpush3.bf16.msra.mxu1 %v655_v23  ;;  %v690_v30 = vpop.eup %689  ;;  %642 = vmatprep.subr.bf16.mxu0 %v693_v0  ;;  %v676_v62 = vpack.c.bf16 %v382_v61, %v381_v60 }
  0x11   :  { %585 = vmatprep.subr.mxu1 %v695_v4  ;;  %v118_v32 = vmul.f32 0.6931472, %v690_v30 }
  0x12   :  { %471 = vrot.lane.b32.xlu0 %v469_v53, %s697_s30 }
  0x13   :  { %644 = vmatpush3.bf16.msra.mxu0 %v643_v29 }
  0x14   :  { %586 = vmatpush3.msra.mxu1 %v129_v31  ;;  %564 = vmatprep.subr.mxu0 %v695_v4 }
  0x15   :  { %588 = vmatmul.mubr.msk.f32.vlgmr.msra.gmra.mrb[0].mxu1 %vm42_vm1, %v118_v32  ;;  %657 = vmatprep.subr.bf16.mxu1 %v693_v0 }
  0x16   :  { %659 = vmatpush3.bf16.msra.mxu1 %v658_v33  ;;  %619 = vmatprep.mubr.msk.f32.mxu1 %vm694_vm0, %v695_v4 }
  0x17   :  { %660 = vmatprep.subr.bf16.mxu1 %v693_v0  ;;  %565 = vmatpush3.msra.mxu0 %v41_v36 }
  0x18   :  { %567 = vmatmul.mubr.msk.f32.vlgmr.msra.gmra.mrb[0].mxu0 %vm42_vm1, %v32_v9  ;;  %590 = vmatprep.subr.mxu0 %v695_v4 }
  0x19   :  { %592 = vmatprep.mubr.msk.f32.mxu0 %vm694_vm0, %v695_v4  ;;  %591 = vmatpush3.msk.msra.mxu0 %vm228_vm2, %v223_v50 }
  0x1a   :  { %662 = vmatpush3.bf16.msra.mxu1 %v661_v37  ;;  %675 = vmatprep.subr.bf16.mxu0 %v693_v0 }
  0x1b   :  { %663 = vmatprep.subr.bf16.mxu1 %v693_v0 }
  0x1c   :  { %593 = vmatmul.mubr.msk.f32.vlgmr.msra.gmra.mrb[2].mxu0 %vm224_vm3, %v222_v51 }
  0x1d   :  { %630 = vmatprep.mubr.msk.f32.mxu0 %vm694_vm0, %v695_v4  ;;  %677 = vmatpush3.bf16.msra.mxu0 %v676_v62  ;;  %v679_v4 = vpack.c.bf16 %v384_v3, %v383_v2 }
  0x1e   :  { %665 = vmatpush3.bf16.msra.mxu1 %v664_v40  ;;  %678 = vmatprep.subr.bf16.mxu0 %v693_v0 }
  0x1f   :  { %666 = vmatprep.subr.bf16.mxu1 %v693_v0 }
  0x21   :  { %680 = vmatpush3.bf16.msra.mxu0 %v679_v4 }
  0x22   :  { %668 = vmatpush3.bf16.msra.mxu1 %v667_v43 }
  0x23   :  { %669 = vmatprep.subr.bf16.mxu1 %v693_v0 }
  0x26   :  { %671 = vmatpush3.bf16.msra.mxu1 %v670_v46 }
  0x27   :  { %672 = vmatprep.subr.bf16.mxu1 %v693_v0  ;;  %v506_v0 = vld [vmem:[%s910_s8 + $0x1] ss:$0 sm:$0xff] }
  0x2a   :  { %674 = vmatpush3.bf16.msra.mxu1 %v673_v49 }
  0x80   :  { %v377_v6 = vpop.permute.xlu0 %376 }
  0x84   :  { %v472_v17 = vpop.permute.xlu0 %471 }
  0xe8   :  { %v205_v54 = vpop.f32.mrb[0].mxu1 }
  0xe9   :  { %v206_v55 = vadd.f32 %v501_v52, %v205_v54  ;;  %v589_v56 = vpop.f32.mrb[1].mxu1 }
  0xeb   :  { %v209_v57 = vmax.f32 %v206_v55, 0.0  ;;  %v112_v58 = vpop.f32.mrb[0].mxu0 }
  0xec   :  { %v568_v59 = vpop.f32.mrb[1].mxu0  ;;  %485 = vrot.lane.b32.xlu0 %v112_v58, %s698_s1 }
  0xed   :  { %620 = vmatmul.mubr.msk.f32.vlgmr.msra.gmra.mrb[2].mxu1 %vm302_vm4, %v209_v57 }
  0xef   :  { %v298_v63 = vpop.f32.mrb[2].mxu0 }
  0xf0   :  { %v594_v1 = vpop.f32.mrb[3].mxu0 }
 0x15e   :  { %v486_v24 = vpop.permute.xlu0 %485 }
 0x1c0   :  { %v372_v5 = vpop.f32.mrb[2].mxu1 }
 0x1c1   :  { %v373_v7 = vadd.f32 %v372_v5, %v298_v63  ;;  %v621_v8 = vpop.f32.mrb[3].mxu1 }
 0x1c3   :  { %v379_v9 = vadd.f32 %v377_v6, %v373_v7 }
 0x1c5   :  { %v380_v10 = vmax.f32 %v379_v9, 0.0 }
 0x1c7   :  { %631 = vmatmul.mubr.msk.f32.vlgmr.msra.gmra.mrb[4].mxu0 %vm391_vm5, %v380_v10 }
 0x29a   :  { %v461_v11 = vpop.f32.mrb[4].mxu0 }
 0x29b   :  { %v462_v12 = vadd.f32 %v506_v0, %v461_v11  ;;  %v632_v13 = vpop.f32.mrb[5].mxu0 }
 0x29d   :  { %v465_v14 = vmul.f32 0.5, %v462_v12 }
 0x29f   :  { %v466_v15 = vmul.f32 1.442695, %v465_v14 }
 0x2a1   :  { %691 = vpow2.f32 %v466_v15 }
 0x2ab   :  { %v692_v16 = vpop.eup %691 }
 0x2ac   :  { %v474_v18 = vmul.f32 %v692_v16, %v472_v17  ;;  %v468_v21 = vmul.f32 %v692_v16, %v692_v16 }
 0x2ae   :  { %476 = vrot.lane.b32.xlu1 %v474_v18, %s699_s6  ;;  %v489_v23 = vsel %vm488_vm6, %v462_v12, %v468_v21 }
 0x320   :  { %v477_v19 = vpop.permute.xlu1 %476 }
 0x321   :  { %v479_v20 = vadd.f32 %v477_v19, %v462_v12 }
 0x323   :  { %481 = vrot.lane.b32.xlu1 %v479_v20, %s700_s18 }
 0x395   :  { %v482_v22 = vpop.permute.xlu1 %481 }
 0x396   :  { %v491_v25 = vsel %vm490_vm7, %v489_v23, %v482_v22 }
 0x397   :  { %v493_v26 = vsel %vm492_vm8, %v491_v25, %v486_v24 }
 0x398   :  { %495 = vst.msk [vmem:[%s914_s9] sm:$0x3] %vm494_vm9, %v493_v26 }

</bundles_post_ra>
